<compile_context>
chip_gen: v5e
topology: v5e:2x2
jax: 0.10.0
libtpu: 0.0.40
codegen_flags: <defaults>
</compile_context>

<pallas_src>
import math
import functools

import jax
import jax.numpy as jnp
from jax.experimental import pallas as pl
from jax.experimental.pallas import tpu as pltpu


def _build_pe_table(max_len: int, d_model: int) -> jnp.ndarray:
    """Deterministic sin/cos positional-encoding table, shape [max_len, d_model]."""
    position = jnp.arange(0, max_len, dtype=jnp.float32)[:, None]            # [max_len, 1]
    div_term = jnp.exp(
        jnp.arange(0, d_model, 2, dtype=jnp.float32) * (-math.log(10000.0) / d_model)
    )                                                                         # [d_model/2]
    pe = jnp.zeros((max_len, d_model), dtype=jnp.float32)
    pe = pe.at[:, 0::2].set(jnp.sin(position * div_term))
    pe = pe.at[:, 1::2].set(jnp.cos(position * div_term))
    return pe


# ---------------------------------------------------------------------------
# Kernels: plain lane-dense 2D add (+ optional inverted dropout).
# ---------------------------------------------------------------------------

def _pe_add_kernel(x_ref, pe_ref, o_ref):
    # x_ref: (ts, B*D) block, pe_ref: (1, B*D) row broadcast over sublanes.
    y = x_ref[...].astype(jnp.float32) + pe_ref[...]
    o_ref[...] = y.astype(o_ref.dtype)


def _pe_add_dropout_kernel(x_ref, pe_ref, rnd_ref, o_ref, *, thr31: int, inv_keep: float):
    y = x_ref[...].astype(jnp.float32) + pe_ref[...]
    # rnd_ref holds uniform 31-bit ints in [0, 2^31); keep with prob (1 - p).
    keep = rnd_ref[...] >= jnp.int32(thr31)
    y = jnp.where(keep, y * jnp.float32(inv_keep), jnp.zeros_like(y))
    o_ref[...] = y.astype(o_ref.dtype)


# ---------------------------------------------------------------------------
# Wrapper
# ---------------------------------------------------------------------------

def _pick_row_tile(S: int, row_bytes: int, target_bytes: int = 2 * 1024 * 1024) -> int:
    """Largest multiple-of-8 row count giving ~target_bytes blocks, clamped to S."""
    if S <= 8:
        return S
    ts = max(1, target_bytes // max(row_bytes, 1))
    if ts >= S:
        # Whole array would fit one block; still prefer >= 2 grid steps so the
        # v7x megacore can shard this memory-bound parallel axis across TCs.
        if S >= 16:
            return min(S, (((S + 1) // 2) + 7) // 8 * 8)
        return S
    return min(S, max(8, (ts // 8) * 8))


def positional_encoding(x, pe_table, *, p: float = 0.1, training: bool = False,
                        rng_key=None):
    """x: [S, B, D]; pe_table: [max_len, D].  Returns dropout(x + pe[:, :x.size(1)])."""
    S, B, D = x.shape
    max_len, d_model = pe_table.shape
    assert d_model == D, "embed dim mismatch"
    assert B <= max_len, "pe[:, :x.size(1)] requires x.size(1) <= max_len"

    BD = B * D
    out_dtype = x.dtype
    x2 = x.reshape(S, BD)                                     # lane-dense 2D view
    # Literal torch slicing pe[:, :x.size(1)] -> rows indexed by x's dim1.
    pe_row = pe_table[:B, :].astype(jnp.float32).reshape(1, BD)

    row_bytes = BD * x.dtype.itemsize
    ts = _pick_row_tile(S, row_bytes)
    grid = (pl.cdiv(S, ts),)

    x_spec = pl.BlockSpec((ts, BD), lambda i: (i, 0))
    pe_spec = pl.BlockSpec((1, BD), lambda i: (0, 0))
    out_spec = pl.BlockSpec((ts, BD), lambda i: (i, 0))
    cparams = pltpu.CompilerParams(
        dimension_semantics=("parallel",),
        # ~2 MiB blocks x (x, rnd, out) x double-buffering ~= 12 MiB; raise the
        # scoped limit so v5e's 16 MiB default isn't a cliff (32 MiB is the
        # default scoped limit on v6e/v7x and safe on all generations).
        vmem_limit_bytes=32 * 1024 * 1024,
    )

    use_dropout = training and p > 0.0
    if not use_dropout:
        out2 = pl.pallas_call(
            _pe_add_kernel,
            out_shape=jax.ShapeDtypeStruct((S, BD), out_dtype),
            grid_spec=pltpu.PrefetchScalarGridSpec(
                num_scalar_prefetch=0,
                grid=grid,
                in_specs=[x_spec, pe_spec],
                out_specs=out_spec,
            ),
            compiler_params=cparams,
        )(x2, pe_row)
        return out2.reshape(S, B, D)

    if rng_key is None:
        rng_key = jax.random.PRNGKey(0)
    # TODO(synk): torch's nn.Dropout RNG stream cannot be matched bit-for-bit;
    # we use jax.random bits (tile-size independent) fed to the kernel instead.
    bits = jax.random.bits(rng_key, (S, BD), dtype=jnp.uint32)
    rnd31 = jnp.right_shift(bits, jnp.uint32(1)).astype(jnp.int32)   # [0, 2^31)
    thr31 = min(int(round(p * float(1 << 31))), (1 << 31) - 1)
    inv_keep = (1.0 / (1.0 - p)) if p < 1.0 else 0.0

    kernel = functools.partial(_pe_add_dropout_kernel, thr31=thr31, inv_keep=inv_keep)
    out2 = pl.pallas_call(
        kernel,
        out_shape=jax.ShapeDtypeStruct((S, BD), out_dtype),
        grid_spec=pltpu.PrefetchScalarGridSpec(
            num_scalar_prefetch=0,
            grid=grid,
            in_specs=[x_spec, pe_spec, pl.BlockSpec((ts, BD), lambda i: (i, 0))],
            out_specs=out_spec,
        ),
        compiler_params=cparams,
    )(x2, pe_row, rnd31)
    return out2.reshape(S, B, D)


if __name__ == "__main__":
    # Small shapes consistent with the module: x: [seq_len=8, batch=2, d_model=32]
    S, B, D = 8, 2, 32
    MAX_LEN = 16
    P_DROP = 0.1

    key = jax.random.PRNGKey(0)
    kx, kd = jax.random.split(key)
    x = jax.random.normal(kx, (S, B, D), dtype=jnp.float32)
    pe_table = _build_pe_table(MAX_LEN, D)

    # Eval mode (dropout = identity): exact check against the reference
    # x + pe[:, :x.size(1)]  (pe broadcast over dim0, sliced along dim1).
    out = jax.block_until_ready(
        positional_encoding(x, pe_table, p=P_DROP, training=False)
    )
    ref = x + pe_table[None, :B, :]
    assert out.shape == (S, B, D)
    assert jnp.allclose(out, ref, atol=1e-6, rtol=1e-6)

    # Training mode: every element must be either 0 (dropped) or ref/(1-p) (kept).
    out_train = jax.block_until_ready(
        positional_encoding(x, pe_table, p=P_DROP, training=True, rng_key=kd)
    )
    assert out_train.shape == (S, B, D)
    scaled = ref / (1.0 - P_DROP)
    ok = jnp.isclose(out_train, scaled, atol=1e-5) | jnp.isclose(out_train, 0.0, atol=1e-7)
    assert bool(jnp.all(ok))

    print("KERNEL_OK")
</pallas_src>

<mosaic_0001>
module attributes {stable_mosaic.version = 11 : i64} {
  func.func @_pe_add_kernel(%arg0: i32, %arg1: memref<8x64xf32, #tpu.memory_space<vmem>>, %arg2: memref<1x64xf32, #tpu.memory_space<vmem>>, %arg3: memref<8x64xf32, #tpu.memory_space<vmem>>) attributes {dimension_semantics = [#tpu.dimension_semantics<parallel>], iteration_bounds = array<i64: 1>, scalar_prefetch = 0 : i64, scratch_operands = 0 : i64, tpu.core_type = #tpu.core_type<tc>, window_params = [{transform_indices = @transform_0, window_bounds = array<i64: 8, 64>}, {pipeline_mode = #tpu.pipeline_mode<synchronous>, transform_indices = @transform_1, window_bounds = array<i64: 1, 64>}, {transform_indices = @transform_2, window_bounds = array<i64: 8, 64>}]} {
    %c0 = arith.constant 0 : index
    %c0_0 = arith.constant 0 : index
    %0 = vector.load %arg1[%c0, %c0_0] : memref<8x64xf32, #tpu.memory_space<vmem>>, vector<8x64xf32>
    %c0_1 = arith.constant 0 : index
    %c0_2 = arith.constant 0 : index
    %1 = vector.load %arg2[%c0_1, %c0_2] : memref<1x64xf32, #tpu.memory_space<vmem>>, vector<1x64xf32>
    %2 = vector.broadcast %1 : vector<1x64xf32> to vector<8x64xf32>
    %3 = arith.addf %0, %2 : vector<8x64xf32>
    %c0_3 = arith.constant 0 : index
    %c0_4 = arith.constant 0 : index
    %4 = vector.load %arg3[%c0_3, %c0_4] : memref<8x64xf32, #tpu.memory_space<vmem>>, vector<8x64xf32>
    tpu.vector_store %arg3[%c0_3, %c0_4], %3 {strides = array<i32>} : memref<8x64xf32, #tpu.memory_space<vmem>>, vector<8x64xf32>,
    return
  }
  func.func @transform_0(%arg0: i32) -> (i32, i32) {
    %c0_i32 = arith.constant 0 : i32
    %c0_i32_0 = arith.constant 0 : i32
    return %arg0, %c0_i32 : i32, i32
  }
  func.func @transform_1(%arg0: i32) -> (i32, i32) {
    %c0_i32 = arith.constant 0 : i32
    %c0_i32_0 = arith.constant 0 : i32
    %c0_i32_1 = arith.constant 0 : i32
    return %c0_i32, %c0_i32_0 : i32, i32
  }
  func.func @transform_2(%arg0: i32) -> (i32, i32) {
    %c0_i32 = arith.constant 0 : i32
    %c0_i32_0 = arith.constant 0 : i32
    return %arg0, %c0_i32 : i32, i32
  }
}

</mosaic_0001>

<bundles_post_ra>
// kernel: tpu_custom_call.1
= control target key start
LH: loop header
LB: loop body
LE: loop exit
PB: predicated region body
PF: predicated region fallthrough
CT: control target
= control target key end

     0   :  { %7 = vsyncpa [#allocation3], 0  ;;  %s175_s0 = inlined_call_operand.hbm [shape: f32[8,64], index: 0, kind: input, shape index: {}]   ;;  %s176_s1 = inlined_call_operand.hbm [shape: f32[1,64], index: 1, kind: input, shape index: {}]   ;;  %s177_s2 = inlined_call_operand.hbm [shape: f32[8,64], index: 2, kind: output, shape index: {}]  }
   0x1   :  { %8 = vsyncpa [#allocation6], 0 }
   0x2   :  { %9 = vsyncpa [#allocation4], 0  ;;  %s15_s11 = sshll.u32 %s175_s0, 4  ;;  %s148_s12 = smov [#allocation2]   ;;  %s16_s11 = int_to_ptr.hbm [resolvable:$true] %s15_s11 }
   0x3   :  { %s17_s13 = sshll.u32 %s148_s12, 4  ;;  %s26_s16 = sshll.u32 %s176_s1, 4  ;;  %s18_s13 = int_to_ptr.vmem [resolvable:$true] %s17_s13  ;;  %s27_s16 = int_to_ptr.hbm [resolvable:$true] %s26_s16 }
   0x4   :  { %20 = dma.hbm_to_vmem [thread:$0]  %s16_s11, 128, %s18_s13, [#allocation3]  }
   0x5   :  { %s149_s17 = smov [#allocation5]  }
   0x6   :  { %s28_s18 = sshll.u32 %s149_s17, 4  ;;  %s29_s18 = int_to_ptr.vmem [resolvable:$true] %s28_s18 }
   0x7   :  { %31 = dma.hbm_to_vmem [thread:$0]  %s27_s16, 16, %s29_s18, [#allocation6]  }
   0x8   :  { %142 = dma.done.wait [#allocation3], 128  }
   0x9   :  { %143 = vsyncadd [#allocation3], 4294967168 }
   0xa   :  { %144 = dma.done.wait [#allocation6], 16  }
   0xb   :  { %145 = vsyncadd [#allocation6], 4294967280  ;;  %s150_s19 = smov [#allocation7]   ;;  %s55_s22 = sshll.u32 %s177_s2, 4  ;;  %v40_v0 = vld [vmem:[#allocation2] sm:$0xff]  ;;  %vm46_vm0 = vcmask 523264   ;;  %s56_s22 = int_to_ptr.hbm [resolvable:$true] %s55_s22 }
   0xc   :  { %s53_s0 = sshll.u32 %s150_s19, 4  ;;  %v69_v1 = vld [vmem:[#allocation5] ss:$0 sm:$0xff]  ;;  %s54_s0 = int_to_ptr.vmem [resolvable:$true] %s53_s0 }
   0xd   :  { %v45_v2 = vadd.f32 %v69_v1, %v40_v0 }
   0xf   :  { %47 = vst.msk [vmem:[#allocation7] sm:$0xff] %vm46_vm0, %v45_v2 }
  0x10   :  { %58 = dma.vmem_to_hbm [thread:$0]  %s54_s0, 128, %s56_s22, [#allocation4]  }
  0x11   :  { %146 = dma.done.wait [#allocation4], 128  }
  0x12   :  { %147 = vsyncadd [#allocation4], 4294967168 }
  0x13   :  { %63 = vsyncpa [#allocation3], 1 }
  0x14   :  { %64 = vsyncpa [#allocation6], 1 }
  0x15   :  { %65 = vsyncpa [#allocation4], 1 }

</bundles_post_ra>
